<compile_context>
chip_gen: v6e
topology: v6e:2x2x1
jax: 0.10.0
libtpu: 0.0.40
codegen_flags: <defaults>
</compile_context>

<pallas_src>
import numpy as np
from types import SimpleNamespace

import jax
import jax.numpy as jnp
from jax.experimental import pallas as pl
from jax.experimental.pallas import tpu as pltpu

_MAX_TILE = 32768          # lanes per grid step (multiple of 128)
_FAST_PATH_MAX_P = 4096    # below this, skip Pallas and use fused XLA


def _round_up(x, m):
    return ((x + m - 1) // m) * m


def _choose_tile(P, max_tile=_MAX_TILE):
    """Pick a lane tile: big (amortize per-step cost), multiple of 128, and a
    divisor of P when possible so P_pad == P and no post-kernel crop is needed."""
    p128 = _round_up(P, 128)
    if p128 <= max_tile:
        return p128                         # single tile
    if P % 128 == 0:
        n_units = P // 128
        best = 128
        for t in range(1, n_units + 1):
            if n_units % t == 0 and t * 128 <= max_tile:
                best = t * 128
        return best                          # divisor of P -> P_pad == P
    return max_tile


# ---------------------------------------------------------------------------
# Kernel: one lane tile of the flattened (y*M + x) output per grid step.
# ---------------------------------------------------------------------------
def _seidel2wf_kernel(seidel_ref, basis_ref, o_ref):
    """seidel_ref : (B, K)     whole batch of Seidel coefficients (f32)
       basis_ref  : (K, TILE)  pre-masked, flattened Seidel-basis slab
       o_ref      : (B, TILE)  wavefront tile (aperture already applied)"""
    o_ref[...] = jnp.dot(seidel_ref[...], basis_ref[...],
                         preferred_element_type=jnp.float32)


# ---------------------------------------------------------------------------
# Host-side preprocessing (done once per color, cached by the wrapper).
# ---------------------------------------------------------------------------
def prepare_basis(sel_basis, *, tile=None, max_tile=_MAX_TILE):
    """Flatten the (M, M, K) basis to (K, P), fold in the rho >= 1 aperture
    mask, and pad the lane dim to a multiple of the chosen tile."""
    sel_basis = jnp.asarray(sel_basis, jnp.float32)
    M = sel_basis.shape[0]
    K = sel_basis.shape[-1]
    P = M * M

    # rho grid: torch.linspace(-1,1,M) + meshgrid(indexing='ij').
    x = jnp.linspace(-1.0, 1.0, M, dtype=jnp.float32)
    Yg, Xg = jnp.meshgrid(x, x, indexing="ij")
    rho = jnp.sqrt(Xg * Xg + Yg * Yg).reshape(1, P)
    mask = (rho < 1.0).astype(jnp.float32)                  # (1, P)

    # basis_flat[i, y*M + x] = sel_basis[y, x, i], pre-masked by the aperture.
    basis_flat = sel_basis.reshape(P, K).T * mask           # (K, P)

    if tile is not None:
        TILE = _round_up(int(tile), 128)
    else:
        TILE = _choose_tile(P, max_tile)
    P_pad = _round_up(P, TILE)
    basis_p = jnp.pad(basis_flat, ((0, 0), (0, P_pad - P)))  # padded lanes = 0

    return dict(basis=basis_p, M=M, K=K, P=P, P_pad=P_pad, tile=TILE)


def _seidel2wavefront_pallas(seidel, prep):
    seidel = jnp.asarray(seidel, jnp.float32)
    B, K = seidel.shape
    assert K == prep["K"], (K, prep["K"])
    basis_p = prep["basis"]
    M, P, P_pad, TILE = prep["M"], prep["P"], prep["P_pad"], prep["tile"]
    n_tiles = P_pad // TILE

    wf_flat = pl.pallas_call(
        _seidel2wf_kernel,
        out_shape=jax.ShapeDtypeStruct((B, P_pad), jnp.float32),
        grid_spec=pltpu.PrefetchScalarGridSpec(
            num_scalar_prefetch=0,
            grid=(n_tiles,),
            in_specs=[
                pl.BlockSpec((B, K), lambda p: (0, 0)),      # resident, full extent
                pl.BlockSpec((K, TILE), lambda p: (0, p)),   # streamed lane tiles
            ],
            out_specs=pl.BlockSpec((B, TILE), lambda p: (0, p)),
        ),
        compiler_params=pltpu.CompilerParams(
            dimension_semantics=("parallel",)),
    )(seidel, basis_p)

    if P_pad != P:
        wf_flat = wf_flat[:, :P]
    return wf_flat.reshape(B, M, M)


def _seidel2wavefront_xla(seidel, sel_basis):
    """Fused XLA fast path for tiny wavefronts (launch cost >> work)."""
    seidel = jnp.asarray(seidel, jnp.float32)
    sel_basis = jnp.asarray(sel_basis, jnp.float32)
    M = sel_basis.shape[0]
    wf = jnp.einsum("bk,yxk->byx", seidel, sel_basis)
    x = jnp.linspace(-1.0, 1.0, M, dtype=jnp.float32)
    Yg, Xg = jnp.meshgrid(x, x, indexing="ij")
    rho = jnp.sqrt(Xg * Xg + Yg * Yg)
    return jnp.where(rho >= 1.0, 0.0, wf)


def seidel2wavefront(seidel, sel_basis, *, tile=None, force_pallas=False):
    """Convenience entry point: seidel (B, K), sel_basis (M, M, K) -> (B, M, M)."""
    M = sel_basis.shape[0]
    P = M * M
    if P <= _FAST_PATH_MAX_P and not force_pallas:
        return _seidel2wavefront_xla(seidel, sel_basis)
    prep = prepare_basis(sel_basis, tile=tile)
    return _seidel2wavefront_pallas(seidel, prep)


class Seidel2Wavefront:
    """Mirrors the PyTorch module signature forward(seidel, IS, color, BS).
    Caches the preprocessed (flattened, pre-masked, padded) basis per color."""

    def __init__(self, max_tile=_MAX_TILE, fast_path_max_p=_FAST_PATH_MAX_P):
        self._prep_cache = {}
        self._max_tile = max_tile
        self._fast_path_max_p = fast_path_max_p

    def __call__(self, seidel, IS, color, BS):
        sel_basis = IS.seidel_basis[color]
        M = sel_basis.shape[0]   # == IS.wf_res[color]; BS implied by seidel.shape[0]
        if M * M <= self._fast_path_max_p:
            return _seidel2wavefront_xla(seidel, sel_basis)
        prep = self._prep_cache.get(color)
        if prep is None:
            prep = prepare_basis(sel_basis, max_tile=self._max_tile)
            self._prep_cache[color] = prep
        return _seidel2wavefront_pallas(seidel, prep)


def _reference(seidel, sel_basis):
    """Pure-JAX reference mirroring the PyTorch code 1:1."""
    seidel = jnp.asarray(seidel, jnp.float32)
    sel_basis = jnp.asarray(sel_basis, jnp.float32)
    B, K = seidel.shape
    M = sel_basis.shape[0]
    seidel2 = jnp.broadcast_to(seidel[:, None, None, :], (B, M, M, K))
    A = jnp.broadcast_to(sel_basis[None], (B, M, M, K))
    WF = jnp.zeros((B, M, M), jnp.float32)
    for i in range(K):
        WF = WF + A[..., i] * seidel2[..., i]
    x = jnp.linspace(-1.0, 1.0, M, dtype=jnp.float32)
    Yg, Xg = jnp.meshgrid(x, x, indexing="ij")
    rho = jnp.abs(jnp.sqrt(Xg * Xg + Yg * Yg))
    return jnp.where(rho >= 1.0, 0.0, WF)


if __name__ == "__main__":
    key = jax.random.PRNGKey(0)
    k1, k2, k3, k4 = jax.random.split(key, 4)
    K = 6

    # --- Case 1: shipped small wavefront (M=16, BS=2) via the module wrapper
    #     (takes the fused-XLA fast path; P = 256).
    BS1, M1 = 2, 16
    seidel1 = jax.random.normal(k1, (BS1, K), dtype=jnp.float32)
    basis1 = jax.random.uniform(k2, (M1, M1, K), dtype=jnp.float32,
                                minval=-1.0, maxval=1.0)
    IS = SimpleNamespace(wf_res=[M1], seidel_basis=[basis1])
    model = Seidel2Wavefront()
    out1 = jax.block_until_ready(model(seidel1, IS, color=0, BS=BS1))
    ref1 = jax.block_until_ready(_reference(seidel1, basis1))
    assert out1.shape == (BS1, M1, M1), out1.shape
    err1 = float(np.max(np.abs(np.asarray(out1) - np.asarray(ref1))))
    assert err1 < 1e-3, err1

    # --- Case 2: Pallas path, single tile, P = 1600 (not a multiple of 128),
    #     odd batch (BS=3) to exercise the unpadded-B output store.
    BS2, M2 = 3, 40
    seidel2 = jax.random.normal(k3, (BS2, K), dtype=jnp.float32)
    basis2 = jax.random.uniform(k4, (M2, M2, K), dtype=jnp.float32,
                                minval=-1.0, maxval=1.0)
    out2 = jax.block_until_ready(
        seidel2wavefront(seidel2, basis2, force_pallas=True))
    ref2 = jax.block_until_ready(_reference(seidel2, basis2))
    assert out2.shape == (BS2, M2, M2), out2.shape
    err2 = float(np.max(np.abs(np.asarray(out2) - np.asarray(ref2))))
    assert err2 < 1e-3, err2

    # --- Case 3: Pallas path with a forced small tile so n_tiles > 1 and the
    #     lane pad/crop path (P_pad = 2048 > P = 1600, 4 grid steps) is covered.
    out3 = jax.block_until_ready(
        seidel2wavefront(seidel2, basis2, tile=512, force_pallas=True))
    err3 = float(np.max(np.abs(np.asarray(out3) - np.asarray(ref2))))
    assert err3 < 1e-3, err3

    print("KERNEL_OK")
</pallas_src>

<mosaic_0001>
module attributes {stable_mosaic.version = 11 : i64} {
  func.func @_seidel2wf_kernel(%arg0: i32, %arg1: memref<3x6xf32, #tpu.memory_space<vmem>>, %arg2: memref<6x1664xf32, #tpu.memory_space<vmem>>, %arg3: memref<3x1664xf32, #tpu.memory_space<vmem>>) attributes {dimension_semantics = [#tpu.dimension_semantics<parallel>], iteration_bounds = array<i64: 1>, scalar_prefetch = 0 : i64, scratch_operands = 0 : i64, tpu.core_type = #tpu.core_type<tc>, window_params = [{pipeline_mode = #tpu.pipeline_mode<synchronous>, transform_indices = @transform_0, window_bounds = array<i64: 3, 6>}, {transform_indices = @transform_1, window_bounds = array<i64: 6, 1664>}, {transform_indices = @transform_2, window_bounds = array<i64: 3, 1664>}]} {
    %c0 = arith.constant 0 : index
    %c0_0 = arith.constant 0 : index
    %0 = vector.load %arg1[%c0, %c0_0] : memref<3x6xf32, #tpu.memory_space<vmem>>, vector<3x6xf32>
    %c0_1 = arith.constant 0 : index
    %c0_2 = arith.constant 0 : index
    %1 = vector.load %arg2[%c0_1, %c0_2] : memref<6x1664xf32, #tpu.memory_space<vmem>>, vector<6x1664xf32>
    %cst = arith.constant dense<0.000000e+00> : vector<3x1664xf32>
    %2 = tpu.matmul %0, %1, %cst {dimension_numbers = #tpu.dot_dimension_numbers<[1], [0], [0], [1], [0, 0, 1, 1], [], []>} : vector<3x6xf32>, vector<6x1664xf32>, vector<3x1664xf32> -> vector<3x1664xf32>
    %c0_3 = arith.constant 0 : index
    %c0_4 = arith.constant 0 : index
    %3 = vector.load %arg3[%c0_3, %c0_4] : memref<3x1664xf32, #tpu.memory_space<vmem>>, vector<3x1664xf32>
    tpu.vector_store %arg3[%c0_3, %c0_4], %2 {strides = array<i32>} : memref<3x1664xf32, #tpu.memory_space<vmem>>, vector<3x1664xf32>,
    return
  }
  func.func @transform_0(%arg0: i32) -> (i32, i32) {
    %c0_i32 = arith.constant 0 : i32
    %c0_i32_0 = arith.constant 0 : i32
    %c0_i32_1 = arith.constant 0 : i32
    return %c0_i32, %c0_i32_0 : i32, i32
  }
  func.func @transform_1(%arg0: i32) -> (i32, i32) {
    %c0_i32 = arith.constant 0 : i32
    %c0_i32_0 = arith.constant 0 : i32
    return %c0_i32, %arg0 : i32, i32
  }
  func.func @transform_2(%arg0: i32) -> (i32, i32) {
    %c0_i32 = arith.constant 0 : i32
    %c0_i32_0 = arith.constant 0 : i32
    return %c0_i32, %arg0 : i32, i32
  }
}

</mosaic_0001>

<bundles_post_ra>
// kernel: tpu_custom_call.1
= control target key start
LH: loop header
LB: loop body
LE: loop exit
PB: predicated region body
PF: predicated region fallthrough
CT: control target
= control target key end

     0   :  { %7 = vsyncpa [#allocation3], 0  ;;  %s784_s0 = inlined_call_operand.hbm [shape: f32[3,6], index: 0, kind: input, shape index: {}]   ;;  %s785_s1 = inlined_call_operand.hbm [shape: f32[6,1664], index: 1, kind: input, shape index: {}]   ;;  %s786_s2 = inlined_call_operand.hbm [shape: f32[3,1664], index: 2, kind: output, shape index: {}]  }
   0x1   :  { %8 = vsyncpa [#allocation6], 0 }
   0x2   :  { %9 = vsyncpa [#allocation4], 0  ;;  %s735_s9 = smov [#allocation2]   ;;  %s736_s11 = smov [#allocation5]  }
   0x3   :  { %s16_s10 = sshll.u32 %s735_s9, 4  ;;  %s26_s12 = sshll.u32 %s736_s11, 4  ;;  %s17_s10 = int_to_ptr.vmem [resolvable:$true] %s16_s10  ;;  %s27_s12 = int_to_ptr.vmem [resolvable:$true] %s26_s12 }
   0x4   :  { %s677_s13 = scalar_lea.vmem %s17_s10, 64  ;;  %p682_p1 = scmp.lt.s32.totalorder %s17_s10, %s17_s10 }
   0x5   :  { %p678_p0 = scmp.ne.s32.totalorder %s17_s10, %s677_s13  ;;  %p683_p2 = scmp.lt.s32.totalorder %s677_s13, %s677_s13 }
   0x7   :  { %p684_p3 = por %p683_p2, %p682_p1 }
   0x9   :  { %p685_p4 = pnand %p684_p3, %p678_p0 }
   0xb   :  { %688 = shalt.err (!%p685_p4)
}
   0xc   :  { %19 = dma.hbm_to_vmem [thread:$0]  %s784_s0, 64, %s17_s10, [#allocation3]  }
   0xd   :  { %s697_s16 = scalar_lea.vmem %s27_s12, 1664  ;;  %p702_p6 = scmp.lt.s32.totalorder %s27_s12, %s27_s12 }
   0xe   :  { %p698_p5 = scmp.ne.s32.totalorder %s27_s12, %s697_s16  ;;  %p703_p7 = scmp.lt.s32.totalorder %s697_s16, %s697_s16 }
  0x10   :  { %p704_p8 = por %p703_p7, %p702_p6 }
  0x12   :  { %p705_p9 = pnand %p704_p8, %p698_p5 }
  0x14   :  { %708 = shalt.err (!%p705_p9)
}
  0x15   :  { %29 = dma.hbm_to_vmem [thread:$0]  %s785_s1, 1664, %s27_s12, [#allocation6]  }
  0x16   :  { %729 = dma.done.wait [#allocation3], 64  }
  0x17   :  { %730 = vsyncadd [#allocation3], 4294967232 }
  0x18   :  { %731 = dma.done.wait [#allocation6], 1664  }
  0x19   :  { %732 = vsyncadd [#allocation6], 4294965632  ;;  %v737_v0 = vmov 0.0   ;;  %vm54_vm0 = vcmask 1045504   ;;  %vm50_vm1 = vcmask 48128   ;;  %vm738_vm2 = vmmov 0  }
  0x1a   :  { %158 = vmatprep.mubr.f32.mxu0 %v737_v0  ;;  %229 = vmatprep.mubr.f32.mxu1 %v737_v0  ;;  %v38_v1 = vld [vmem:[#allocation5 + $0x8] sm:$0x3f]  ;;  %v40_v2 = vld [vmem:[#allocation5 + $0x18] sm:$0x3f]  ;;  %v37_v3 = vld [vmem:[#allocation5] sm:$0x3f] }
  0x1b   :  { %637 = vmatprep.subr.msk.mxu0 %vm54_vm0, %v38_v1  ;;  %640 = vmatprep.subr.msk.mxu1 %vm54_vm0, %v40_v2  ;;  %v39_v4 = vld [vmem:[#allocation5 + $0x10] sm:$0x3f]  ;;  %v36_v5 = vld [vmem:[#allocation2] sm:$0x7]  ;;  %v42_v6 = vld [vmem:[#allocation5 + $0x28] sm:$0x3f] }
  0x1c   :  { %638 = vmatpush1.msk.msra.mxu0 %vm54_vm0, %v37_v3  ;;  %641 = vmatpush1.msk.msra.mxu1 %vm54_vm0, %v39_v4  ;;  %v44_v7 = vld [vmem:[#allocation5 + $0x38] sm:$0x3f]  ;;  %v41_v8 = vld [vmem:[#allocation5 + $0x20] sm:$0x3f]  ;;  %v43_v9 = vld [vmem:[#allocation5 + $0x30] sm:$0x3f] }
  0x1d   :  { %639 = vmatmul.mubr.msk.f32.vlgmr.msra.gmra.mxu0 %vm50_vm1, %v36_v5  ;;  %642 = vmatmul.mubr.msk.f32.vlgmr.msra.gmra.mxu1 %vm50_vm1, %v36_v5  ;;  %v46_v10 = vld [vmem:[#allocation5 + $0x48] sm:$0x3f]  ;;  %v48_v11 = vld [vmem:[#allocation5 + $0x58] sm:$0x3f]  ;;  %v45_v12 = vld [vmem:[#allocation5 + $0x40] sm:$0x3f] }
  0x1e   :  { %643 = vmatprep.subr.msk.mxu0 %vm54_vm0, %v42_v6  ;;  %646 = vmatprep.subr.msk.mxu1 %vm54_vm0, %v44_v7  ;;  %v47_v13 = vld [vmem:[#allocation5 + $0x50] sm:$0x3f]  ;;  %v49_v14 = vld [vmem:[#allocation5 + $0x60] sm:$0x3f]  ;;  %s739_s0 = smov [#allocation7]  }
  0x1f   :  { %644 = vmatpush1.msk.msra.mxu0 %vm54_vm0, %v41_v8  ;;  %647 = vmatpush1.msk.msra.mxu1 %vm54_vm0, %v43_v9  ;;  %s627_s1 = sshll.u32 %s739_s0, 4  ;;  %s628_s1 = int_to_ptr.vmem [resolvable:$true] %s627_s1 }
  0x20   :  { %300 = vmatprep.mubr.f32.mxu0 %v737_v0  ;;  %371 = vmatprep.mubr.f32.mxu1 %v737_v0  ;;  %s709_s19 = scalar_lea.vmem %s628_s1, 832  ;;  %p714_p11 = scmp.lt.s32.totalorder %s628_s1, %s628_s1 }
  0x21   :  { %645 = vmatmul.mubr.msk.f32.vlgmr.msra.gmra.mxu0 %vm50_vm1, %v36_v5  ;;  %648 = vmatmul.mubr.msk.f32.vlgmr.msra.gmra.mxu1 %vm50_vm1, %v36_v5  ;;  %p710_p10 = scmp.ne.s32.totalorder %s628_s1, %s709_s19  ;;  %p715_p12 = scmp.lt.s32.totalorder %s709_s19, %s709_s19 }
  0x22   :  { %649 = vmatprep.subr.msk.mxu0 %vm54_vm0, %v46_v10  ;;  %652 = vmatprep.subr.msk.mxu1 %vm54_vm0, %v48_v11 }
  0x23   :  { %650 = vmatpush1.msk.msra.mxu0 %vm54_vm0, %v45_v12  ;;  %653 = vmatpush1.msk.msra.mxu1 %vm54_vm0, %v47_v13  ;;  %p716_p13 = por %p715_p12, %p714_p11 }
  0x24   :  { %442 = vmatprep.mubr.f32.mxu0 %v737_v0  ;;  %513 = vmatprep.mubr.f32.mxu1 %v737_v0 }
  0x25   :  { %651 = vmatmul.mubr.msk.f32.vlgmr.msra.gmra.mxu0 %vm50_vm1, %v36_v5  ;;  %654 = vmatmul.mubr.msk.f32.vlgmr.msra.gmra.mxu1 %vm50_vm1, %v36_v5  ;;  %p717_p0 = pnand %p716_p13, %p710_p10 }
  0x26   :  { %659 = vmatprep.subr.mxu0 %v737_v0  ;;  %661 = vmatprep.mubr.msk.f32.mxu0 %vm738_vm2, %v737_v0 }
  0x27   :  { %660 = vmatpush3.msk.msra.mxu0 %vm54_vm0, %v49_v14 }
  0x29   :  { %662 = vmatmul.mubr.msk.f32.vlgmr.msra.gmra.mxu0 %vm50_vm1, %v36_v5 }
  0xdd   :  { %v160_v15 = vpop.f32.mrf.mxu0  ;;  %v231_v16 = vpop.f32.mrf.mxu1 }
  0xdf   :  { %v162_v17 = vpop.f32.mrf.mxu0  ;;  %v233_v18 = vpop.f32.mrf.mxu1 }
  0xe0   :  { %v602_v19 = vcombine.low %v160_v15, %v162_v17  ;;  %v603_v20 = vcombine.low %v231_v16, %v233_v18 }
  0xe1   :  { %v302_v21 = vpop.f32.mrf.mxu0  ;;  %v373_v22 = vpop.f32.mrf.mxu1 }
  0xe2   :  { %614 = vst [vmem:[#allocation7] sm:$0x77] %v602_v19  ;;  %615 = vst [vmem:[#allocation7 + $0x8] sm:$0x77] %v603_v20 }
  0xe3   :  { %v304_v23 = vpop.f32.mrf.mxu0  ;;  %v375_v24 = vpop.f32.mrf.mxu1 }
  0xe4   :  { %v604_v25 = vcombine.low %v302_v21, %v304_v23  ;;  %v605_v26 = vcombine.low %v373_v22, %v375_v24 }
  0xe5   :  { %v444_v27 = vpop.f32.mrf.mxu0  ;;  %v515_v28 = vpop.f32.mrf.mxu1 }
  0xe6   :  { %616 = vst [vmem:[#allocation7 + $0x10] sm:$0x77] %v604_v25  ;;  %617 = vst [vmem:[#allocation7 + $0x18] sm:$0x77] %v605_v26 }
  0xe7   :  { %v446_v29 = vpop.f32.mrf.mxu0  ;;  %v517_v30 = vpop.f32.mrf.mxu1 }
  0xe8   :  { %v606_v31 = vcombine.low %v444_v27, %v446_v29  ;;  %v607_v32 = vcombine.low %v515_v28, %v517_v30 }
  0xe9   :  { %v586_v33 = vpop.f32.mrf.mxu0 }
  0xea   :  { %618 = vst [vmem:[#allocation7 + $0x20] sm:$0x77] %v606_v31  ;;  %619 = vst [vmem:[#allocation7 + $0x28] sm:$0x77] %v607_v32 }
  0xeb   :  { %620 = vst [vmem:[#allocation7 + $0x30] sm:$0x7] %v586_v33  ;;  %v663_v34 = vpop.f32.mrf.mxu0 }
  0xec   :  { %720 = shalt.err (!%p717_p0)
}
  0xed   :  { %630 = dma.vmem_to_hbm [thread:$0]  %s628_s1, 832, %s786_s2, [#allocation4]  }
  0xee   :  { %733 = dma.done.wait [#allocation4], 832  }
  0xef   :  { %734 = vsyncadd [#allocation4], 4294966464 }
  0xf0   :  { %634 = vsyncpa [#allocation3], 1 }
  0xf1   :  { %635 = vsyncpa [#allocation6], 1 }
  0xf2   :  { %636 = vsyncpa [#allocation4], 1 }

</bundles_post_ra>
